<compile_context>
chip_gen: v7x
topology: tpu7x:2x2x1
jax: 0.10.0
libtpu: 0.0.40
codegen_flags: <defaults>
</compile_context>

<pallas_src>
import jax
import jax.numpy as jnp
import numpy as np
from jax.experimental import pallas as pl
from jax.experimental.pallas import tpu as pltpu

_BN_EPS = 1e-5   # matches torch.nn.BatchNorm2d default


# ----------------------------------------------------------------------------
# Fused Conv2d (+ bias) (+ eval-mode BatchNorm2d) Pallas kernel
# ----------------------------------------------------------------------------
def conv_block_forward(x, w, b, *, kernel, stride, padding, bn=None,
                       compute_dtype=jnp.float32, cout_tile=128):
    """x: (N, Cin, H, W)  w: (Cout, Cin, K, K)  b: (Cout,)
    bn: None or (running_mean, running_var, gamma, beta), each (Cout,).
    compute_dtype: jnp.float32 (exact) or jnp.bfloat16 (fast MXU path on
    v6e/v7x); accumulation is always f32.
    Returns (N, Cout, H_out, W_out) float32 in NCHW.
    """
    N, Cin, H, W = x.shape
    Cout = w.shape[0]
    K, S, p = kernel, stride, padding

    Hp, Wp = H + 2 * p, W + 2 * p
    Ho1, Wo1 = Hp - K + 1, Wp - K + 1          # stride-1 conv output size
    L = Ho1 * Wp                               # flat compute length (lanes)
    M = (Hp + 1) * Wp                          # flat padded input length
    KKC = K * K * Cin                          # stacked contraction depth

    ct = min(cout_tile, Cout)
    assert Cout % ct == 0, "Cout must be divisible by the Cout tile"
    n_co = Cout // ct

    # Zero-pad spatially (+1 extra bottom row so every tap slice of length L is
    # in bounds) and flatten H,W -> one lane axis.  Stays in NCHW.
    xpad = jnp.pad(x, ((0, 0), (0, 0), (p, p + 1), (p, p)))
    xflat = xpad.reshape(N, Cin, M).astype(compute_dtype)

    # Weight matrix with columns ordered (tap t = dy*K+dx major, Cin minor) to
    # match the slab row order built in-kernel.
    w_mat = jnp.transpose(w, (0, 2, 3, 1)).reshape(Cout, KKC).astype(compute_dtype)

    # Fold bias + eval-mode BN into a single per-channel affine (scale, shift).
    if bn is not None:
        mu, var, g, beta = bn
        scale = (g * jax.lax.rsqrt(var.astype(jnp.float32) + _BN_EPS)).astype(jnp.float32)
        shift = ((b - mu) * scale + beta).astype(jnp.float32)
    else:
        scale = jnp.ones((Cout,), jnp.float32)
        shift = b.astype(jnp.float32)
    scale = scale.reshape(Cout, 1)
    shift = shift.reshape(Cout, 1)

    # Static flat offsets of the K*K taps over the padded, flattened spatial axis.
    offs = tuple(dy * Wp + dx for dy in range(K) for dx in range(K))

    # f32 path: force the accurate MXU algorithm; bf16 path: native MXU.
    prec = jax.lax.Precision.HIGHEST if compute_dtype == jnp.float32 else None

    def kernel_fn(x_ref, w_ref, scale_ref, shift_ref, o_ref, slab_ref):
        # Rebuild the shifted-activation slab only when the batch block changes
        # (the Cout-tile axis is innermost, so that is exactly co == 0).
        @pl.when(pl.program_id(1) == 0)
        def _build_slab():
            for t, off in enumerate(offs):
                slab_ref[t * Cin:(t + 1) * Cin, :] = x_ref[0, :, off:off + L]

        # One MXU matmul: (ct, Cin*K*K) x (Cin*K*K, L) -> f32 (ct, L).
        acc = jnp.dot(w_ref[...], slab_ref[...],
                      preferred_element_type=jnp.float32, precision=prec)

        # Fused bias + BatchNorm as a single per-channel affine.
        o_ref[0] = (acc * scale_ref[...] + shift_ref[...]).astype(o_ref.dtype)

    itemsize = jnp.dtype(compute_dtype).itemsize
    cost = pl.CostEstimate(
        flops=2 * N * Cout * KKC * L,
        transcendentals=0,
        bytes_accessed=(N * Cin * M * itemsize + Cout * KKC * itemsize
                        + 2 * Cout * 4 + N * Cout * L * 4),
    )

    out_flat = pl.pallas_call(
        kernel_fn,
        out_shape=jax.ShapeDtypeStruct((N, Cout, L), jnp.float32),
        grid=(N, n_co),
        in_specs=[
            pl.BlockSpec((1, Cin, M), lambda n, co: (n, 0, 0)),   # resident over co
            pl.BlockSpec((ct, KKC), lambda n, co: (co, 0)),
            pl.BlockSpec((ct, 1), lambda n, co: (co, 0)),
            pl.BlockSpec((ct, 1), lambda n, co: (co, 0)),
        ],
        out_specs=pl.BlockSpec((1, ct, L), lambda n, co: (n, co, 0)),
        scratch_shapes=[pltpu.VMEM((KKC, L), compute_dtype)],
        compiler_params=pltpu.CompilerParams(
            dimension_semantics=("parallel", "parallel"),
            vmem_limit_bytes=32 * 1024 * 1024),
        cost_estimate=cost,
    )(xflat, w_mat, scale, shift)

    # Drop the (K-1) garbage columns per row; output is already NCHW.
    out = out_flat.reshape(N, Cout, Ho1, Wp)[:, :, :, :Wo1]
    if S > 1:
        # exact: out_strided[h, w] = out_stride1[S*h, S*w]
        out = out[:, :, ::S, ::S]
    return out


# ----------------------------------------------------------------------------
# Pure-JAX reference (correctness check)
# ----------------------------------------------------------------------------
def _ref_forward(x, w, b, *, stride, padding, bn=None):
    y = jax.lax.conv_general_dilated(
        x, w, window_strides=(stride, stride),
        padding=[(padding, padding), (padding, padding)],
        dimension_numbers=("NCHW", "OIHW", "NCHW"),
        precision=jax.lax.Precision.HIGHEST)
    y = y + b.reshape(1, -1, 1, 1)
    if bn is not None:
        mu, var, g, beta = (v.reshape(1, -1, 1, 1) for v in bn)
        y = (y - mu) * jax.lax.rsqrt(var + _BN_EPS) * g + beta
    return y


# ----------------------------------------------------------------------------
# Main
# ----------------------------------------------------------------------------
if __name__ == "__main__":
    N, Cin, H, W = 2, 4, 16, 16
    Cout, K, S, P = 8, 3, 1, 1

    key = jax.random.PRNGKey(0)
    ks = jax.random.split(key, 7)
    w = 0.3 * jax.random.normal(ks[0], (Cout, Cin, K, K), jnp.float32)
    b = 0.1 * jax.random.normal(ks[1], (Cout,), jnp.float32)
    bn_gamma = 1.0 + 0.1 * jax.random.normal(ks[2], (Cout,), jnp.float32)
    bn_beta = 0.1 * jax.random.normal(ks[3], (Cout,), jnp.float32)
    bn_mean = 0.1 * jax.random.normal(ks[4], (Cout,), jnp.float32)
    bn_var = 0.5 + jax.random.uniform(ks[5], (Cout,), jnp.float32)
    x = jax.random.normal(ks[6], (N, Cin, H, W), jnp.float32)
    bn = (bn_mean, bn_var, bn_gamma, bn_beta)

    H_out = (H + 2 * P - K) // S + 1
    W_out = (W + 2 * P - K) // S + 1

    # --- references --------------------------------------------------------
    ref_bn = jax.block_until_ready(_ref_forward(x, w, b, stride=S, padding=P, bn=bn))
    ref_nobn = jax.block_until_ready(_ref_forward(x, w, b, stride=S, padding=P, bn=None))

    # --- f32 exact path (compare_batch_norm=True), tight tolerance ---------
    fwd_f32 = jax.jit(lambda x, w, b, bn: conv_block_forward(
        x, w, b, kernel=K, stride=S, padding=P, bn=bn, compute_dtype=jnp.float32))
    out = jax.block_until_ready(fwd_f32(x, w, b, bn))
    assert out.shape == (N, Cout, H_out, W_out), out.shape
    np.testing.assert_allclose(np.asarray(out), np.asarray(ref_bn),
                               rtol=1e-4, atol=1e-4)

    # --- f32 path without BatchNorm (compare_batch_norm=False) -------------
    fwd_f32_nobn = jax.jit(lambda x, w, b: conv_block_forward(
        x, w, b, kernel=K, stride=S, padding=P, bn=None, compute_dtype=jnp.float32))
    out_nobn = jax.block_until_ready(fwd_f32_nobn(x, w, b))
    assert out_nobn.shape == (N, Cout, H_out, W_out), out_nobn.shape
    np.testing.assert_allclose(np.asarray(out_nobn), np.asarray(ref_nobn),
                               rtol=1e-4, atol=1e-4)

    # --- bf16 MXU fast path (recommended on v6e/v7x), looser tolerance -----
    fwd_bf16 = jax.jit(lambda x, w, b, bn: conv_block_forward(
        x, w, b, kernel=K, stride=S, padding=P, bn=bn, compute_dtype=jnp.bfloat16))
    out_bf16 = jax.block_until_ready(fwd_bf16(x, w, b, bn))
    assert out_bf16.shape == (N, Cout, H_out, W_out), out_bf16.shape
    np.testing.assert_allclose(np.asarray(out_bf16), np.asarray(ref_bn),
                               rtol=5e-2, atol=5e-2)

    print("KERNEL_OK")
</pallas_src>

<mosaic_0001>
module attributes {stable_mosaic.version = 11 : i64} {
  func.func @kernel_fn(%arg0: i32, %arg1: i32, %arg2: memref<1x4x342xf32, #tpu.memory_space<vmem>>, %arg3: memref<8x36xf32, #tpu.memory_space<vmem>>, %arg4: memref<8x1xf32, #tpu.memory_space<vmem>>, %arg5: memref<8x1xf32, #tpu.memory_space<vmem>>, %arg6: memref<1x8x288xf32, #tpu.memory_space<vmem>>, %arg7: memref<36x288xf32, #tpu.memory_space<vmem>>) attributes {dimension_semantics = [#tpu.dimension_semantics<parallel>, #tpu.dimension_semantics<parallel>], iteration_bounds = array<i64: 2, 1>, scalar_prefetch = 0 : i64, scratch_operands = 1 : i64, tpu.core_type = #tpu.core_type<tc>, window_params = [{transform_indices = @transform_0, window_bounds = array<i64: 1, 4, 342>}, {transform_indices = @transform_1, window_bounds = array<i64: 8, 36>}, {transform_indices = @transform_2, window_bounds = array<i64: 8, 1>}, {transform_indices = @transform_3, window_bounds = array<i64: 8, 1>}, {transform_indices = @transform_4, window_bounds = array<i64: 1, 8, 288>}]} {
    %c0_i32 = arith.constant 0 : i32
    %0 = arith.cmpi eq, %arg1, %c0_i32 : i32
    %1 = arith.extui %0 : i1 to i32
    %c0_i32_0 = arith.constant 0 : i32
    %2 = arith.cmpi ne, %1, %c0_i32_0 : i32
    scf.if %2 {
      %c0_11 = arith.constant 0 : index
      %c0_12 = arith.constant 0 : index
      %c0_13 = arith.constant 0 : index
      %15 = vector.load %arg2[%c0_11, %c0_12, %c0_13] : memref<1x4x342xf32, #tpu.memory_space<vmem>>, vector<1x4x288xf32>
      %16 = vector.shape_cast %15 : vector<1x4x288xf32> to vector<4x288xf32>
      %c0_14 = arith.constant 0 : index
      %c0_15 = arith.constant 0 : index
      %17 = vector.load %arg7[%c0_14, %c0_15] : memref<36x288xf32, #tpu.memory_space<vmem>>, vector<4x288xf32>
      tpu.vector_store %arg7[%c0_14, %c0_15], %16 {strides = array<i32>} : memref<36x288xf32, #tpu.memory_space<vmem>>, vector<4x288xf32>,
      %c0_16 = arith.constant 0 : index
      %c0_17 = arith.constant 0 : index
      %c1 = arith.constant 1 : index
      %18 = vector.load %arg2[%c0_16, %c0_17, %c1] : memref<1x4x342xf32, #tpu.memory_space<vmem>>, vector<1x4x288xf32>
      %19 = vector.shape_cast %18 : vector<1x4x288xf32> to vector<4x288xf32>
      %c4 = arith.constant 4 : index
      %c0_18 = arith.constant 0 : index
      %20 = vector.load %arg7[%c4, %c0_18] : memref<36x288xf32, #tpu.memory_space<vmem>>, vector<4x288xf32>
      tpu.vector_store %arg7[%c4, %c0_18], %19 {strides = array<i32>} : memref<36x288xf32, #tpu.memory_space<vmem>>, vector<4x288xf32>,
      %c0_19 = arith.constant 0 : index
      %c0_20 = arith.constant 0 : index
      %c2 = arith.constant 2 : index
      %21 = vector.load %arg2[%c0_19, %c0_20, %c2] : memref<1x4x342xf32, #tpu.memory_space<vmem>>, vector<1x4x288xf32>
      %22 = vector.shape_cast %21 : vector<1x4x288xf32> to vector<4x288xf32>
      %c8 = arith.constant 8 : index
      %c0_21 = arith.constant 0 : index
      %23 = vector.load %arg7[%c8, %c0_21] : memref<36x288xf32, #tpu.memory_space<vmem>>, vector<4x288xf32>
      tpu.vector_store %arg7[%c8, %c0_21], %22 {strides = array<i32>} : memref<36x288xf32, #tpu.memory_space<vmem>>, vector<4x288xf32>,
      %c0_22 = arith.constant 0 : index
      %c0_23 = arith.constant 0 : index
      %c18 = arith.constant 18 : index
      %24 = vector.load %arg2[%c0_22, %c0_23, %c18] : memref<1x4x342xf32, #tpu.memory_space<vmem>>, vector<1x4x288xf32>
      %25 = vector.shape_cast %24 : vector<1x4x288xf32> to vector<4x288xf32>
      %c12 = arith.constant 12 : index
      %c0_24 = arith.constant 0 : index
      %26 = vector.load %arg7[%c12, %c0_24] : memref<36x288xf32, #tpu.memory_space<vmem>>, vector<4x288xf32>
      tpu.vector_store %arg7[%c12, %c0_24], %25 {strides = array<i32>} : memref<36x288xf32, #tpu.memory_space<vmem>>, vector<4x288xf32>,
      %c0_25 = arith.constant 0 : index
      %c0_26 = arith.constant 0 : index
      %c19 = arith.constant 19 : index
      %27 = vector.load %arg2[%c0_25, %c0_26, %c19] : memref<1x4x342xf32, #tpu.memory_space<vmem>>, vector<1x4x288xf32>
      %28 = vector.shape_cast %27 : vector<1x4x288xf32> to vector<4x288xf32>
      %c16 = arith.constant 16 : index
      %c0_27 = arith.constant 0 : index
      %29 = vector.load %arg7[%c16, %c0_27] : memref<36x288xf32, #tpu.memory_space<vmem>>, vector<4x288xf32>
      tpu.vector_store %arg7[%c16, %c0_27], %28 {strides = array<i32>} : memref<36x288xf32, #tpu.memory_space<vmem>>, vector<4x288xf32>,
      %c0_28 = arith.constant 0 : index
      %c0_29 = arith.constant 0 : index
      %c20 = arith.constant 20 : index
      %30 = vector.load %arg2[%c0_28, %c0_29, %c20] : memref<1x4x342xf32, #tpu.memory_space<vmem>>, vector<1x4x288xf32>
      %31 = vector.shape_cast %30 : vector<1x4x288xf32> to vector<4x288xf32>
      %c20_30 = arith.constant 20 : index
      %c0_31 = arith.constant 0 : index
      %32 = vector.load %arg7[%c20_30, %c0_31] : memref<36x288xf32, #tpu.memory_space<vmem>>, vector<4x288xf32>
      tpu.vector_store %arg7[%c20_30, %c0_31], %31 {strides = array<i32>} : memref<36x288xf32, #tpu.memory_space<vmem>>, vector<4x288xf32>,
      %c0_32 = arith.constant 0 : index
      %c0_33 = arith.constant 0 : index
      %c36 = arith.constant 36 : index
      %33 = vector.load %arg2[%c0_32, %c0_33, %c36] : memref<1x4x342xf32, #tpu.memory_space<vmem>>, vector<1x4x288xf32>
      %34 = vector.shape_cast %33 : vector<1x4x288xf32> to vector<4x288xf32>
      %c24 = arith.constant 24 : index
      %c0_34 = arith.constant 0 : index
      %35 = vector.load %arg7[%c24, %c0_34] : memref<36x288xf32, #tpu.memory_space<vmem>>, vector<4x288xf32>
      tpu.vector_store %arg7[%c24, %c0_34], %34 {strides = array<i32>} : memref<36x288xf32, #tpu.memory_space<vmem>>, vector<4x288xf32>,
      %c0_35 = arith.constant 0 : index
      %c0_36 = arith.constant 0 : index
      %c37 = arith.constant 37 : index
      %36 = vector.load %arg2[%c0_35, %c0_36, %c37] : memref<1x4x342xf32, #tpu.memory_space<vmem>>, vector<1x4x288xf32>
      %37 = vector.shape_cast %36 : vector<1x4x288xf32> to vector<4x288xf32>
      %c28 = arith.constant 28 : index
      %c0_37 = arith.constant 0 : index
      %38 = vector.load %arg7[%c28, %c0_37] : memref<36x288xf32, #tpu.memory_space<vmem>>, vector<4x288xf32>
      tpu.vector_store %arg7[%c28, %c0_37], %37 {strides = array<i32>} : memref<36x288xf32, #tpu.memory_space<vmem>>, vector<4x288xf32>,
      %c0_38 = arith.constant 0 : index
      %c0_39 = arith.constant 0 : index
      %c38 = arith.constant 38 : index
      %39 = vector.load %arg2[%c0_38, %c0_39, %c38] : memref<1x4x342xf32, #tpu.memory_space<vmem>>, vector<1x4x288xf32>
      %40 = vector.shape_cast %39 : vector<1x4x288xf32> to vector<4x288xf32>
      %c32 = arith.constant 32 : index
      %c0_40 = arith.constant 0 : index
      %41 = vector.load %arg7[%c32, %c0_40] : memref<36x288xf32, #tpu.memory_space<vmem>>, vector<4x288xf32>
      tpu.vector_store %arg7[%c32, %c0_40], %40 {strides = array<i32>} : memref<36x288xf32, #tpu.memory_space<vmem>>, vector<4x288xf32>,
    } else {
    }
    %c0 = arith.constant 0 : index
    %c0_1 = arith.constant 0 : index
    %3 = vector.load %arg3[%c0, %c0_1] : memref<8x36xf32, #tpu.memory_space<vmem>>, vector<8x36xf32>
    %c0_2 = arith.constant 0 : index
    %c0_3 = arith.constant 0 : index
    %4 = vector.load %arg7[%c0_2, %c0_3] : memref<36x288xf32, #tpu.memory_space<vmem>>, vector<36x288xf32>
    %cst = arith.constant dense<0.000000e+00> : vector<8x288xf32>
    %5 = tpu.matmul %3, %4, %cst {dimension_numbers = #tpu.dot_dimension_numbers<[1], [0], [0], [1], [0, 0, 1, 1], [], []>, precision = #tpu.contract_precision<fp32>} : vector<8x36xf32>, vector<36x288xf32>, vector<8x288xf32> -> vector<8x288xf32>
    %c0_4 = arith.constant 0 : index
    %c0_5 = arith.constant 0 : index
    %6 = vector.load %arg4[%c0_4, %c0_5] : memref<8x1xf32, #tpu.memory_space<vmem>>, vector<8x1xf32>
    %7 = vector.broadcast %6 : vector<8x1xf32> to vector<8x288xf32>
    %8 = arith.mulf %5, %7 : vector<8x288xf32>
    %c0_6 = arith.constant 0 : index
    %c0_7 = arith.constant 0 : index
    %9 = vector.load %arg5[%c0_6, %c0_7] : memref<8x1xf32, #tpu.memory_space<vmem>>, vector<8x1xf32>
    %10 = vector.broadcast %9 : vector<8x1xf32> to vector<8x288xf32>
    %11 = arith.addf %8, %10 : vector<8x288xf32>
    %c0_8 = arith.constant 0 : index
    %c0_9 = arith.constant 0 : index
    %c0_10 = arith.constant 0 : index
    %12 = vector.load %arg6[%c0_8, %c0_9, %c0_10] : memref<1x8x288xf32, #tpu.memory_space<vmem>>, vector<1x8x288xf32>
    %13 = vector.shape_cast %12 : vector<1x8x288xf32> to vector<8x288xf32>
    %14 = vector.shape_cast %11 : vector<8x288xf32> to vector<1x8x288xf32>
    tpu.vector_store %arg6[%c0_8, %c0_9, %c0_10], %14 {strides = array<i32>} : memref<1x8x288xf32, #tpu.memory_space<vmem>>, vector<1x8x288xf32>,
    return
  }
  func.func @transform_0(%arg0: i32, %arg1: i32) -> (i32, i32, i32) {
    %c0_i32 = arith.constant 0 : i32
    %c0_i32_0 = arith.constant 0 : i32
    %c0_i32_1 = arith.constant 0 : i32
    return %arg0, %c0_i32, %c0_i32_0 : i32, i32, i32
  }
  func.func @transform_1(%arg0: i32, %arg1: i32) -> (i32, i32) {
    %c0_i32 = arith.constant 0 : i32
    %c0_i32_0 = arith.constant 0 : i32
    return %arg1, %c0_i32 : i32, i32
  }
  func.func @transform_2(%arg0: i32, %arg1: i32) -> (i32, i32) {
    %c0_i32 = arith.constant 0 : i32
    %c0_i32_0 = arith.constant 0 : i32
    return %arg1, %c0_i32 : i32, i32
  }
  func.func @transform_3(%arg0: i32, %arg1: i32) -> (i32, i32) {
    %c0_i32 = arith.constant 0 : i32
    %c0_i32_0 = arith.constant 0 : i32
    return %arg1, %c0_i32 : i32, i32
  }
  func.func @transform_4(%arg0: i32, %arg1: i32) -> (i32, i32, i32) {
    %c0_i32 = arith.constant 0 : i32
    %c0_i32_0 = arith.constant 0 : i32
    return %arg0, %arg1, %c0_i32 : i32, i32, i32
  }
}

</mosaic_0001>

<bundles_post_ra>
// kernel: _lambda_.1
= control target key start
LH: loop header
LB: loop body
LE: loop exit
PB: predicated region body
PF: predicated region fallthrough
CT: control target
= control target key end

     0   :  { %s2034_s15 = smov 0   ;;  %s2036_s16 = smov 0   ;;  %s2355_s0 = inlined_call_operand.vmem [shape: f32[2,4,342], index: 0, kind: input, shape index: {}]   ;;  %s2356_s1 = inlined_call_operand.vmem [shape: f32[8,36], index: 1, kind: input, shape index: {}]   ;;  %s2357_s2 = inlined_call_operand.vmem [shape: f32[8,1], index: 2, kind: input, shape index: {}]   ;;  %s2358_s3 = inlined_call_operand.vmem [shape: f32[8,1], index: 3, kind: input, shape index: {}]   ;;  %s2359_s4 = inlined_call_operand.vmem [shape: f32[2,8,288], index: 4, kind: output, shape index: {}]  }
   0x1   :  { %s2038_s17 = smov 0  }
   0x2 LB: > { %s26_s18 = sadd.s32 1, %s1991_s16  ;;  %p1704_p0 = scmp.ge.s32.totalorder %s1995_s17, 1  ;;  %s1995_s17 = sphi %s2038_s17, %s14_s17   ;;  %s1991_s16 = sphi %s2036_s16, %s2361_s16   ;;  %s1987_s15 = sphi %s2034_s15, %s2360_s15  }
   0x3   : > { %p28_p1 = scmp.ge.s32.totalorder %s26_s18, 2  ;;  %p203_p2 = scmp.lt.s32.totalorder %s1995_s17, 3 }
   0x5   : > { %s2363_s18 = smov (%p28_p1, %s26_s18), 0  ;;  %p204_p3 = pnand %p1704_p0, %p203_p2 }
   0x6   : > { %p245_p4 = scmp.lt.s32.totalorder (!%p204_p3), %s1987_s15, 1  ;;  %s1997_s23 = smov (!%p204_p3), 126   ;;  %vm282_vm0 = vcmask (!%p204_p3), 257024   ;;  %v2000_v6 = vmov (!%p204_p3), 0.0|0.0   ;;  %v2006_v13 = vmov (!%p204_p3), 0.0   ;;  %vm2007_vm1 = vmmov (!%p204_p3), 0  }
   0x7   : > { %207 = sbr.rel (%p204_p3) target bundleno = 461 (0x1cd), region = 36  ;;  %s1998_s24 = smov (!%p204_p3), 127   ;;  %1871 = vmatprep.subr.bf16.mxu1 (!%p204_p3), %v2000_v6  ;;  %553 = vmatprep.mubr.f32.mxu0 (!%p204_p3), %v2006_v13  ;;  %v1546_v14 = vld [vmem:[%s2357_s2] sm:$0xff] (!%p204_p3)  ;;  %v2008_v16 = vmov (!%p204_p3), 0   ;;  %vm317_vm2 = vcmask (!%p204_p3), 1031168   ;;  %vm304_vm3 = vcmask (!%p204_p3), 261124  }
   0x8   : > { %s1999_s25 = smov (!%p204_p3), 110   ;;  %s2001_s26 = smov (!%p204_p3), 109   ;;  %1755 = vmatprep.mubr.msk.f32.mxu1 (!%p204_p3), %vm2007_vm1, %v2006_v13  ;;  %v1555_v15 = vld [vmem:[%s2358_s3] sm:$0xff] (!%p204_p3)  ;;  %1965 = vset.pattern.permute.xlu0 (!%p204_p3), %v2008_v16  ;;  %vm338_vm4 = vcmask (!%p204_p3), 900096   ;;  %vm296_vm5 = vcmask (!%p204_p3), 1039360   ;;  %vm358_vm6 = vcmask (!%p204_p3), 891904  }
   0x9   : > { %s2002_s27 = smov (!%p204_p3), 108   ;;  %s2003_s28 = smov (!%p204_p3), 92   ;;  %1966 = vset.pattern.permute.xlu1 (!%p204_p3), %v2008_v16  ;;  %vm379_vm7 = vcmask (!%p204_p3), 883712   ;;  %vm399_vm8 = vcmask (!%p204_p3), 752640   ;;  %v449_v56 = vld [vmem:[%s2356_s1] sm:$0xff] (!%p204_p3)  ;;  %vm465_vm9 = vcmask (!%p204_p3), 293888  }
   0xa   : > { %s2004_s29 = smov (!%p204_p3), 91   ;;  %s2005_s30 = smov (!%p204_p3), 90   ;;  %vm420_vm10 = vcmask (!%p204_p3), 744448   ;;  %v467_v58 = vsel (!%p204_p3), %vm465_vm9, %v449_v56, 0  ;;  %vm440_vm11 = vcmask (!%p204_p3), 736256   ;;  %vm469_vm12 = vcmask (!%p204_p3), 1043456  }
   0xb   : > { %v2110_v63 = vand.u32 (!%p204_p3), 4294901760, %v467_v58  ;;  %vm1566_vm13 = vcmask (!%p204_p3), 261120  }
   0xe   : > { %s2365_s15 = smov (!%p245_p4, %s1987_s15), 1 }
   0xf   : > { %s1927_s19 = smul.u32 12, %s2365_s15 }
  0x10   : > { %s1928_s11 = smul.u32 24, %s2365_s15 }
  0x11   : > { %s2058_s22 = scalar_lea.vmem %s2355_s0, %s1927_s19 }
  0x12   : > { %v307_v0 = vld [vmem:[%s2058_s22 + $0x8] sm:$0xf]  ;;  %v284_v1 = vld [vmem:[%s2058_s22] sm:$0xff]  ;;  %s270_s14 = scalar_lea.vmem %s2359_s4, %s1928_s11 }
  0x13   : > { %315 = vrot.lane.b32.xlu1 %v307_v0, %s1997_s23  ;;  %292 = vrot.lane.b32.xlu0 %v284_v1, %s1998_s24  ;;  %v310_v2 = vcombine.high %v284_v1, %v284_v1  ;;  %280 = vst [vmem:[#allocation2] sm:$0xf] %v284_v1  ;;  %v276_v3 = vld [vmem:[%s2058_s22 + $0x8] sm:$0xf]  ;;  %v288_v7 = vcombine.low %v284_v1, %v284_v1 }
  0x14   : > { %v1969_v4 = vld [vmem:[%s2058_s22 + $0x8] ss:$0 sps:$4 sm:$0xff]   ;;  %283 = vst.msk [vmem:[#allocation2 + $0x10] sm:$0xf] %vm282_vm0, %v276_v3 }
  0x15   : > { %281 = vst [vmem:[#allocation2 + $0x8] sm:$0xf] %v310_v2  ;;  %v1970_v5 = vld [vmem:[%s2058_s22 + $0x8] ss:$0 sps:$4 sm:$0xff]  }
  0x16   : > { %v348_v8 = vld [vmem:[%s2058_s22 + $0x8] sm:$0xf] }
  0x17   : > { %313 = vrot.lane.b32.xlu1 %v310_v2, %s1997_s23  ;;  %334 = vrot.lane.b32.xlu0 %v284_v1, %s1999_s25  ;;  %v1971_v9 = vld [vmem:[%s2058_s22 + $0x8] ss:$0 sps:$4 sm:$0xff]  }
  0x18   : > { %v389_v10 = vld [vmem:[%s2058_s22 + $0x8] sm:$0xf] }
  0x19   : > { %v1972_v11 = vld [vmem:[%s2058_s22 + $0x8] ss:$0 sps:$4 sm:$0xff]  }
  0x1a   : > { %v430_v12 = vld [vmem:[%s2058_s22 + $0x8] sm:$0xf] }
  0x1b   : > { %336 = vrot.lane.b32.xlu1 %v1969_v4, %s1999_s25  ;;  %294 = vrot.lane.b32.xlu0 %v1970_v5, %s1998_s24 }
  0x1f   : > { %311 = vrot.lane.b32.xlu1 %v284_v1, %s1997_s23  ;;  %290 = vrot.lane.b32.xlu0 %v288_v7, %s1998_s24 }
  0x23   : > { %354 = vrot.lane.b32.xlu1 %v310_v2, %s2001_s26  ;;  %332 = vrot.lane.b32.xlu0 %v288_v7, %s1999_s25 }
  0x27   : > { %375 = vrot.lane.b32.xlu1 %v284_v1, %s2002_s27  ;;  %356 = vrot.lane.b32.xlu0 %v348_v8, %s2001_s26 }
  0x2b   : > { %395 = vrot.lane.b32.xlu1 %v310_v2, %s2003_s28  ;;  %377 = vrot.lane.b32.xlu0 %v1971_v9, %s2002_s27 }
  0x2f   : > { %416 = vrot.lane.b32.xlu1 %v284_v1, %s2004_s29  ;;  %397 = vrot.lane.b32.xlu0 %v389_v10, %s2003_s28  ;;  %v2123_v10 = vsub.f32 %v467_v58, %v2110_v63 }
  0x33   : > { %352 = vrot.lane.b32.xlu1 %v284_v1, %s2001_s26  ;;  %418 = vrot.lane.b32.xlu0 %v1972_v11, %s2004_s29 }
  0x37   : > { %393 = vrot.lane.b32.xlu1 %v284_v1, %s2003_s28  ;;  %373 = vrot.lane.b32.xlu0 %v288_v7, %s2002_s27 }
  0x3b   : > { %436 = vrot.lane.b32.xlu1 %v310_v2, %s2005_s30  ;;  %414 = vrot.lane.b32.xlu0 %v288_v7, %s2004_s29 }
  0x3f   : > { %434 = vrot.lane.b32.xlu1 %v284_v1, %s2005_s30  ;;  %438 = vrot.lane.b32.xlu0 %v430_v12, %s2005_s30 }
  0x43   : > { %1549 = vperm.xlu0 %1965, %v1546_v14   ;;  %1558 = vperm.xlu1 %1966, %v1555_v15  }
  0x85   : > { %v316_v17 = vpop.permute.xlu1 %315  ;;  %v293_v18 = vpop.permute.xlu0 %292 }
  0x86   : > { %325 = vst.msk [vmem:[#allocation2 + $0x28] sm:$0xf] %vm282_vm0, %v316_v17 }
  0x89   : > { %v314_v19 = vpop.permute.xlu1 %313  ;;  %v335_v20 = vpop.permute.xlu0 %334 }
  0x8a   : > { %v319_v21 = vsel %vm317_vm2, %v314_v19, %v316_v17 }
  0x8b   : > { %324 = vst [vmem:[#allocation2 + $0x20] sm:$0xf] %v319_v21 }
  0x8d   : > { %v337_v22 = vpop.permute.xlu1 %336  ;;  %v295_v23 = vpop.permute.xlu0 %294 }
  0x8e   : > { %v340_v24 = vsel %vm338_vm4, %v335_v20, %v337_v22  ;;  %346 = vst.msk [vmem:[#allocation2 + $0x28] sm:$0xf0] %vm304_vm3, %v337_v22  ;;  %v298_v25 = vsel %vm296_vm5, %v293_v18, %v295_v23  ;;  %305 = vst.msk [vmem:[#allocation2 + $0x10] sm:$0xf0] %vm304_vm3, %v295_v23 }
  0x8f   : > { %345 = vst [vmem:[#allocation2 + $0x20] sm:$0xf0] %v340_v24  ;;  %303 = vst [vmem:[#allocation2 + $0x8] sm:$0xf0] %v298_v25 }
  0x91   : > { %v312_v26 = vpop.permute.xlu1 %311  ;;  %v291_v27 = vpop.permute.xlu0 %290 }
  0x92   : > { %v318_v28 = vsel %vm317_vm2, %v312_v26, %v314_v19  ;;  %v297_v29 = vsel %vm296_vm5, %v291_v27, %v293_v18  ;;  %v2133_v27 = vand.u32 4294901760, %v2123_v10 }
  0x93   : > { %323 = vst [vmem:[#allocation2 + $0x18] sm:$0xf] %v318_v28  ;;  %302 = vst [vmem:[#allocation2] sm:$0xf0] %v297_v29 }
  0x95   : > { %v355_v30 = vpop.permute.xlu1 %354  ;;  %v333_v31 = vpop.permute.xlu0 %332  ;;  %v452_v32 = vld [vmem:[#allocation2 + $0x10] sm:$0xff]  ;;  %v455_v33 = vld [vmem:[#allocation2 + $0x28] sm:$0xff] }
  0x96   : > { %v339_v34 = vsel %vm338_vm4, %v333_v31, %v335_v20  ;;  %v1049_v35 = vand.u32 4294901760, %v452_v32  ;;  %v1052_v36 = vand.u32 4294901760, %v455_v33  ;;  %v451_v37 = vld [vmem:[#allocation2 + $0x8] sm:$0xff]  ;;  %v454_v38 = vld [vmem:[#allocation2 + $0x20] sm:$0xff] }
  0x97   : > { %344 = vst [vmem:[#allocation2 + $0x18] sm:$0xf0] %v339_v34  ;;  %v479_v39 = vand.u32 4294901760, %v451_v37  ;;  %v483_v40 = vand.u32 4294901760, %v454_v38 }
  0x98   : > { %v2088_v41 = vpack.c.bf16 %v1052_v36, %v1049_v35  ;;  %v2112_v0 = vsub.f32 %v452_v32, %v1049_v35  ;;  %v2114_v1 = vsub.f32 %v455_v33, %v1052_v36 }
  0x99   : > { %v376_v42 = vpop.permute.xlu1 %375  ;;  %v357_v43 = vpop.permute.xlu0 %356  ;;  %v2090_v44 = vpack.c.bf16 %v483_v40, %v479_v39  ;;  %v2116_v2 = vsub.f32 %v451_v37, %v479_v39  ;;  %v2118_v3 = vsub.f32 %v454_v38, %v483_v40 }
  0x9a   : > { %v360_v45 = vsel %vm358_vm6, %v355_v30, %v357_v43  ;;  %366 = vst.msk [vmem:[#allocation2 + $0x40] sm:$0xf] %vm282_vm0, %v357_v43  ;;  %1873 = vmatpush3.bf16.msra.mxu1 %v2088_v41  ;;  %v450_v46 = vld [vmem:[#allocation2] sm:$0xff]  ;;  %v1131_v12 = vand.u32 4294901760, %v2112_v0  ;;  %v1138_v14 = vand.u32 4294901760, %v2114_v1 }
  0x9b   : > { %365 = vst [vmem:[#allocation2 + $0x38] sm:$0xf] %v360_v45  ;;  %1824 = vmatprep.subr.bf16.mxu0 %v2090_v44  ;;  %1874 = vmatprep.subr.bf16.mxu1 %v2000_v6  ;;  %v481_v51 = vand.u32 4294901760, %v450_v46  ;;  %v567_v18 = vand.u32 4294901760, %v2116_v2  ;;  %v579_v19 = vand.u32 4294901760, %v2118_v3 }
  0x9c   : > { %v1139_v31 = vsub.f32 %v2114_v1, %v1138_v14 }
  0x9d   : > { %v396_v47 = vpop.permute.xlu1 %395  ;;  %v378_v48 = vpop.permute.xlu0 %377  ;;  %v2135_v28 = vsub.f32 %v450_v46, %v481_v51  ;;  %v568_v36 = vsub.f32 %v2116_v2, %v567_v18  ;;  %v580_v37 = vsub.f32 %v2118_v3, %v579_v19 }
  0x9e   : > { %v381_v49 = vsel %vm379_vm7, %v376_v42, %v378_v48  ;;  %387 = vst.msk [vmem:[#allocation2 + $0x40] sm:$0xf0] %vm304_vm3, %v378_v48  ;;  %v453_v50 = vld [vmem:[#allocation2 + $0x18] sm:$0xff] }
  0x9f   : > { %386 = vst [vmem:[#allocation2 + $0x38] sm:$0xf0] %v381_v49  ;;  %v485_v52 = vand.u32 4294901760, %v453_v50  ;;  %v569_v56 = vand.u32 4294901760, %v568_v36 }
  0xa1   : > { %v417_v53 = vpop.permute.xlu1 %416  ;;  %v398_v54 = vpop.permute.xlu0 %397  ;;  %v2099_v55 = vpack.c.bf16 %v485_v52, %v481_v51  ;;  %v2129_v20 = vsub.f32 %v453_v50, %v485_v52  ;;  %v1140_v50 = vand.u32 4294901760, %v1139_v31  ;;  %v573_v51 = vand.u32 4294901760, %v2135_v28 }
  0xa2   : > { %v401_v57 = vsel %vm399_vm8, %v396_v47, %v398_v54  ;;  %407 = vst.msk [vmem:[#allocation2 + $0x58] sm:$0xf] %vm282_vm0, %v398_v54 }
  0xa3   : > { %406 = vst [vmem:[#allocation2 + $0x50] sm:$0xf] %v401_v57  ;;  %1826 = vmatpush1.bf16.msra.mxu0 %v2099_v55  ;;  %v585_v43 = vand.u32 4294901760, %v2129_v20  ;;  %v581_v57 = vand.u32 4294901760, %v580_v37 }
  0xa5   : > { %v353_v59 = vpop.permute.xlu1 %352  ;;  %v419_v60 = vpop.permute.xlu0 %418  ;;  %v458_v9 = vld [vmem:[#allocation2 + $0x40] sm:$0xff]  ;;  %v586_v58 = vsub.f32 %v2129_v20, %v585_v43 }
  0xa6   : > { %v359_v61 = vsel %vm358_vm6, %v353_v59, %v355_v30  ;;  %v422_v62 = vsel %vm420_vm10, %v417_v53, %v419_v60  ;;  %428 = vst.msk [vmem:[#allocation2 + $0x58] sm:$0xf0] %vm304_vm3, %v419_v60  ;;  %v457_v11 = vld [vmem:[#allocation2 + $0x38] sm:$0xff]  ;;  %v1055_v22 = vand.u32 4294901760, %v458_v9  ;;  %v1132_v30 = vsub.f32 %v2112_v0, %v1131_v12 }
  0xa7   : > { %364 = vst [vmem:[#allocation2 + $0x30] sm:$0xf] %v359_v61  ;;  %427 = vst [vmem:[#allocation2 + $0x50] sm:$0xf0] %v422_v62  ;;  %v487_v25 = vand.u32 4294901760, %v457_v11 }
  0xa8   : > { %v2166_v48 = vsub.f32 %v458_v9, %v1055_v22  ;;  %v1133_v49 = vand.u32 4294901760, %v1132_v30 }
  0xa9   : > { %v394_v4 = vpop.permute.xlu1 %393  ;;  %v374_v5 = vpop.permute.xlu0 %373  ;;  %v2161_v45 = vsub.f32 %v457_v11, %v487_v25 }
  0xaa   : > { %v400_v7 = vsel %vm399_vm8, %v394_v4, %v396_v47  ;;  %v380_v8 = vsel %vm379_vm7, %v374_v5, %v376_v42  ;;  %v557_v47 = vsub.f32 %v2123_v10, %v2133_v27  ;;  %v1878_v4 = vpack.c.bf16 %v1140_v50, %v1133_v49 }
  0xab   : > { %405 = vst [vmem:[#allocation2 + $0x48] sm:$0xf] %v400_v7  ;;  %385 = vst [vmem:[#allocation2 + $0x30] sm:$0xf0] %v380_v8  ;;  %v591_v61 = vand.u32 4294901760, %v2161_v45  ;;  %v574_v5 = vsub.f32 %v2135_v28, %v573_v51  ;;  %v1145_v7 = vand.u32 4294901760, %v2166_v48 }
  0xac   : > { %v558_v62 = vand.u32 4294901760, %v557_v47 }
  0xad   : > { %v437_v15 = vpop.permute.xlu1 %436  ;;  %v415_v16 = vpop.permute.xlu0 %414  ;;  %v461_v17 = vld [vmem:[#allocation2 + $0x58] sm:$0xff]  ;;  %v1146_v37 = vsub.f32 %v2166_v48, %v1145_v7 }
  0xae   : > { %v421_v21 = vsel %vm420_vm10, %v415_v16, %v417_v53  ;;  %v1058_v23 = vand.u32 4294901760, %v461_v17  ;;  %v460_v24 = vld [vmem:[#allocation2 + $0x50] sm:$0xff] }
  0xaf   : > { %426 = vst [vmem:[#allocation2 + $0x48] sm:$0xf0] %v421_v21  ;;  %v491_v26 = vand.u32 4294901760, %v460_v24 }
  0xb0   : > { %v2137_v29 = vpack.c.bf16 %v1058_v23, %v1055_v22  ;;  %v2157_v40 = vsub.f32 %v461_v17, %v1058_v23  ;;  %v1831_v23 = vpack.c.bf16 %v581_v57, %v569_v56 }
  0xb1   : > { %v435_v32 = vpop.permute.xlu1 %434  ;;  %v439_v33 = vpop.permute.xlu0 %438  ;;  %v2145_v34 = vpack.c.bf16 %v491_v26, %v487_v25  ;;  %v2147_v35 = vsub.f32 %v460_v24, %v491_v26  ;;  %v587_v24 = vand.u32 4294901760, %v586_v58 }
  0xb2   : > { %v441_v38 = vsel %vm440_vm11, %v435_v32, %v437_v15  ;;  %v442_v39 = vsel %vm440_vm11, %v437_v15, %v439_v33  ;;  %448 = vst.msk [vmem:[#allocation2 + $0x70] sm:$0xf] %vm282_vm0, %v439_v33  ;;  %1876 = vmatpush3.bf16.msra.mxu1 %v2137_v29  ;;  %v456_v42 = vld [vmem:[#allocation2 + $0x30] sm:$0xff]  ;;  %v1152_v59 = vand.u32 4294901760, %v2157_v40  ;;  %v592_v32 = vsub.f32 %v2161_v45, %v591_v61 }
  0xb3   : > { %446 = vst [vmem:[#allocation2 + $0x60] sm:$0xf] %v441_v38  ;;  %447 = vst [vmem:[#allocation2 + $0x68] sm:$0xf] %v442_v39  ;;  %1828 = vmatprep.subr.bf16.mxu0 %v2145_v34  ;;  %v489_v46 = vand.u32 4294901760, %v456_v42  ;;  %1753 = vmatprep.subr.mxu1 %v2006_v13  ;;  %v603_v53 = vand.u32 4294901760, %v2147_v35 }
  0xb4   : > { %v1153_v25 = vsub.f32 %v2157_v40, %v1152_v59  ;;  %v593_v58 = vand.u32 4294901760, %v592_v32 }
  0xb5   : > { %v2169_v52 = vsub.f32 %v456_v42, %v489_v46  ;;  %v604_v15 = vsub.f32 %v2147_v35, %v603_v53  ;;  %v575_v42 = vand.u32 4294901760, %v574_v5  ;;  %v1147_v5 = vand.u32 4294901760, %v1146_v37 }
  0xb6   : > { %v459_v54 = vld [vmem:[#allocation2 + $0x48] sm:$0xff]  ;;  %v1154_v50 = vand.u32 4294901760, %v1153_v25  ;;  %v1884_v37 = vpack.c.bf16 %v2114_v1, %v2112_v0  ;;  %v1857_v0 = vpack.c.bf16 %v585_v43, %v573_v51  ;;  %v1859_v1 = vpack.c.bf16 %v603_v53, %v591_v61 }
  0xb7   : > { %v493_v60 = vand.u32 4294901760, %v459_v54  ;;  %v597_v16 = vand.u32 4294901760, %v2169_v52  ;;  %v1833_v57 = vpack.c.bf16 %v587_v24, %v575_v42  ;;  %v1839_v42 = vpack.c.bf16 %v2118_v3, %v2116_v2 }
  0xb8   : > { %v1899_v2 = vpack.c.bf16 %v1152_v59, %v1145_v7 }
  0xb9   : > { %v2181_v8 = vpack.c.bf16 %v493_v60, %v489_v46  ;;  %v2183_v9 = vsub.f32 %v459_v54, %v493_v60  ;;  %v464_v11 = vld [vmem:[#allocation2 + $0x70] sm:$0xf]  ;;  %v605_v46 = vand.u32 4294901760, %v604_v15  ;;  %v598_v47 = vsub.f32 %v2169_v52, %v597_v16 }
  0xba   : > { %v477_v17 = vsel %vm469_vm12, %v464_v11, 0  ;;  %v463_v21 = vld [vmem:[#allocation2 + $0x68] sm:$0xf]  ;;  %v462_v22 = vld [vmem:[#allocation2 + $0x60] sm:$0xf] }
  0xbb   : > { %1830 = vmatpush1.bf16.msra.mxu0 %v2181_v8  ;;  %v2194_v26 = vand.u32 4294901760, %v477_v17  ;;  %v474_v30 = vsel %vm469_vm12, %v463_v21, 0  ;;  %v471_v31 = vsel %vm469_vm12, %v462_v22, 0  ;;  %v609_v38 = vand.u32 4294901760, %v2183_v9 }
  0xbc   : > { %v2201_v33 = vand.u32 4294901760, %v474_v30  ;;  %v2203_v36 = vand.u32 4294901760, %v471_v31  ;;  %v1835_v21 = vpack.c.bf16 %v605_v46, %v593_v58  ;;  %v1881_v22 = vpack.c.bf16 %v1154_v50, %v1147_v5 }
  0xbd   : > { %1754 = vmatpush3.msra.mxu1 %v2194_v26  ;;  %v2211_v39 = vsub.f32 %v477_v17, %v2194_v26  ;;  %v610_v54 = vsub.f32 %v2183_v9, %v609_v38  ;;  %v599_v25 = vand.u32 4294901760, %v598_v47  ;;  %v1841_v46 = vpack.c.bf16 %v2129_v20, %v2135_v28 }
  0xbe   : > { %496 = vmatprep.subr.mxu0 %v2201_v33  ;;  %1877 = vmatprep.subr.bf16.mxu1 %v2000_v6  ;;  %v2219_v49 = vsub.f32 %v471_v31, %v2203_v36  ;;  %v2225_v56 = vsub.f32 %v474_v30, %v2201_v33  ;;  %v1843_v47 = vpack.c.bf16 %v2147_v35, %v2161_v45 }
  0xbf   : > { %498 = vmatpush1.msra.mxu0 %v2203_v36  ;;  %1756 = vmatmul.mubr.f32.vlgmr.msra.gmra.mrb[0].mxu1 %v558_v62  ;;  %v1159_v60 = vand.u32 4294901760, %v2211_v39  ;;  %v611_v11 = vand.u32 4294901760, %v610_v54  ;;  %v1887_v50 = vpack.c.bf16 %v2157_v40, %v2166_v48  ;;  %v1845_v54 = vpack.c.bf16 %v2183_v9, %v2169_v52 }
  0xc0   : > { %1879 = vmatpush3.bf16.msra.mxu1 %v1878_v4  ;;  %1832 = vmatprep.subr.bf16.mxu0 %v1831_v23  ;;  %v615_v15 = vand.u32 4294901760, %v2225_v56  ;;  %v621_v17 = vand.u32 4294901760, %v2219_v49  ;;  %v1861_v3 = vpack.c.bf16 %v609_v38, %v597_v16 }
  0xc1   : > { %559 = vmatmul.mubr.f32.vlgmr.msra.gmra.mrb[0].mxu0 %v558_v62  ;;  %1880 = vmatprep.subr.bf16.mxu1 %v2000_v6  ;;  %v1160_v4 = vsub.f32 %v2211_v39, %v1159_v60  ;;  %v1837_v62 = vpack.c.bf16 %v611_v11, %v599_v25 }
  0xc2   : > { %1834 = vmatpush1.bf16.msra.mxu0 %v1833_v57  ;;  %v616_v24 = vsub.f32 %v2225_v56, %v615_v15  ;;  %1768 = vmatprep.mubr.msk.f32.mxu1 %vm2007_vm1, %v2006_v13  ;;  %v622_v30 = vsub.f32 %v2219_v49, %v621_v17  ;;  %v1855_v57 = vpack.c.bf16 %v579_v19, %v567_v18 }
  0xc3   : > { %1836 = vmatprep.subr.bf16.mxu0 %v1835_v21  ;;  %679 = vmatprep.mubr.f32.mxu0 %v2006_v13  ;;  %v1161_v31 = vand.u32 4294901760, %v1160_v4 }
  0xc4   : > { %1882 = vmatpush3.bf16.msra.mxu1 %v1881_v22  ;;  %v617_v23 = vand.u32 4294901760, %v616_v24  ;;  %v623_v32 = vand.u32 4294901760, %v622_v30 }
  0xc5   : > { %1766 = vmatprep.subr.mxu1 %v2006_v13 }
  0xc6   : > { %1838 = vmatpush1.bf16.msra.mxu0 %v1837_v62 }
  0xc7   : > { %618 = vmatprep.subr.mxu0 %v617_v23 }
  0xc8   : > { %1767 = vmatpush3.msra.mxu1 %v1161_v31 }
  0xc9   : > { %1883 = vmatprep.subr.bf16.mxu1 %v2000_v6  ;;  %1769 = vmatmul.mubr.f32.vlgmr.msra.gmra.mrb[0].mxu1 %v2110_v63 }
  0xca   : > { %624 = vmatpush1.msra.mxu0 %v623_v32  ;;  %1885 = vmatpush3.bf16.msra.mxu1 %v1884_v37 }
  0xcb   : > { %1840 = vmatprep.subr.bf16.mxu0 %v1839_v42  ;;  %681 = vmatmul.mubr.f32.vlgmr.msra.gmra.mrb[0].mxu0 %v2110_v63 }
  0xcc   : > { %1842 = vmatpush1.bf16.msra.mxu0 %v1841_v46  ;;  %1886 = vmatprep.subr.bf16.mxu1 %v2000_v6 }
  0xcd   : > { %1844 = vmatprep.subr.bf16.mxu0 %v1843_v47  ;;  %1781 = vmatprep.mubr.msk.f32.mxu1 %vm2007_vm1, %v2006_v13 }
  0xce   : > { %1888 = vmatpush3.bf16.msra.mxu1 %v1887_v50  ;;  %771 = vmatprep.mubr.f32.mxu0 %v2006_v13 }
  0xcf   : > { %1779 = vmatprep.subr.mxu1 %v2006_v13 }
  0xd0   : > { %1846 = vmatpush1.bf16.msra.mxu0 %v1845_v54 }
  0xd1   : > { %713 = vmatprep.subr.mxu0 %v2225_v56 }
  0xd2   : > { %1780 = vmatpush3.msra.mxu1 %v2211_v39 }
  0xd3   : > { %1889 = vmatprep.subr.bf16.mxu1 %v2000_v6  ;;  %1782 = vmatmul.mubr.f32.vlgmr.msra.gmra.mrb[0].mxu1 %v2123_v10 }
  0xd4   : > { %716 = vmatpush1.msra.mxu0 %v2219_v49  ;;  %1891 = vmatpush3.bf16.msra.mxu1 %v2088_v41 }
  0xd5   : > { %1848 = vmatprep.subr.bf16.mxu0 %v2090_v44  ;;  %774 = vmatmul.mubr.f32.vlgmr.msra.gmra.mrb[0].mxu0 %v2123_v10  ;;  %v1896_v10 = vpack.c.bf16 %v1138_v14, %v1131_v12 }
  0xd6   : > { %1850 = vmatpush1.bf16.msra.mxu0 %v2099_v55  ;;  %1892 = vmatprep.subr.bf16.mxu1 %v2000_v6 }
  0xd7   : > { %1852 = vmatprep.subr.bf16.mxu0 %v2145_v34  ;;  %1794 = vmatprep.mubr.msk.f32.mxu1 %vm2007_vm1, %v2006_v13 }
  0xd8   : > { %1894 = vmatpush3.bf16.msra.mxu1 %v2137_v29  ;;  %854 = vmatprep.mubr.f32.mxu0 %v2006_v13 }
  0xd9   : > { %1792 = vmatprep.subr.mxu1 %v2006_v13 }
  0xda   : > { %1854 = vmatpush1.bf16.msra.mxu0 %v2181_v8 }
  0xdb   : > { %797 = vmatprep.subr.mxu0 %v2201_v33 }
  0xdc   : > { %1793 = vmatpush3.msra.mxu1 %v2194_v26 }
  0xdd   : > { %1895 = vmatprep.subr.bf16.mxu1 %v2000_v6  ;;  %1795 = vmatmul.mubr.f32.vlgmr.msra.gmra.mrb[0].mxu1 %v2133_v27 }
  0xde   : > { %799 = vmatpush1.msra.mxu0 %v2203_v36  ;;  %1897 = vmatpush3.bf16.msra.mxu1 %v1896_v10 }
  0xdf   : > { %1856 = vmatprep.subr.bf16.mxu0 %v1855_v57  ;;  %858 = vmatmul.mubr.f32.vlgmr.msra.gmra.mrb[0].mxu0 %v2133_v27 }
  0xe0   : > { %1858 = vmatpush1.bf16.msra.mxu0 %v1857_v0  ;;  %1898 = vmatprep.subr.bf16.mxu1 %v2000_v6 }
  0xe1   : > { %1860 = vmatprep.subr.bf16.mxu0 %v1859_v1  ;;  %1807 = vmatprep.mubr.msk.f32.mxu1 %vm2007_vm1, %v2006_v13 }
  0xe2   : > { %1900 = vmatpush3.bf16.msra.mxu1 %v1899_v2  ;;  %958 = vmatprep.mubr.f32.mxu0 %v2006_v13 }
  0xe3   : > { %1805 = vmatprep.subr.mxu1 %v2006_v13 }
  0xe4   : > { %1862 = vmatpush1.bf16.msra.mxu0 %v1861_v3 }
  0xe5   : > { %899 = vmatprep.subr.mxu0 %v615_v15 }
  0xe6   : > { %1806 = vmatpush3.msra.mxu1 %v1159_v60 }
  0xe7   : > { %1901 = vmatprep.subr.bf16.mxu1 %v2000_v6  ;;  %1808 = vmatmul.mubr.f32.vlgmr.msra.gmra.mrb[0].mxu1 %v2110_v63 }
  0xe8   : > { %903 = vmatpush1.msra.mxu0 %v621_v17  ;;  %1903 = vmatpush3.bf16.msra.mxu1 %v2088_v41 }
  0xe9   : > { %1864 = vmatprep.subr.bf16.mxu0 %v2090_v44  ;;  %960 = vmatmul.mubr.f32.vlgmr.msra.gmra.mrb[0].mxu0 %v2110_v63  ;;  %v1559_v44 = vpop.permute.xlu1 %1558 }
  0xea   : > { %1866 = vmatpush1.bf16.msra.mxu0 %v2099_v55  ;;  %1904 = vmatprep.subr.bf16.mxu1 %v2000_v6  ;;  %v1550_v6 = vpop.permute.xlu0 %1549 }
  0xeb   : > { %1868 = vmatprep.subr.bf16.mxu0 %v2145_v34  ;;  %1820 = vmatprep.mubr.msk.f32.mxu1 %vm2007_vm1, %v2006_v13 }
  0xec   : > { %1906 = vmatpush3.bf16.msra.mxu1 %v2137_v29  ;;  %1040 = vmatprep.mubr.f32.mxu0 %v2006_v13 }
  0xed   : > { %1818 = vmatprep.subr.mxu1 %v2006_v13 }
  0xee   : > { %1870 = vmatpush1.bf16.msra.mxu0 %v2181_v8 }
  0xef   : > { %983 = vmatprep.subr.mxu0 %v2201_v33 }
  0xf0   : > { %1819 = vmatpush3.msra.mxu1 %v2194_v26 }
  0xf1   : > { %1821 = vmatmul.mubr.f32.vlgmr.msra.gmra.mrb[0].mxu1 %v2110_v63 }
  0xf2   : > { %985 = vmatpush1.msra.mxu0 %v2203_v36 }
  0xf3   : > { %1042 = vmatmul.mubr.f32.vlgmr.msra.gmra.mrb[0].mxu0 %v2110_v63 }
 0x1c4   : > { %v1542_v41 = vpop.f32.mrb[0].mxu1 }
 0x1c5   : > { %v1554_v55 = vmul.f32 %v1550_v6, %v1542_v41  ;;  %v1822_v12 = vpop.f32.mrb[1].mxu1 }
 0x1c6   : > { %v1043_v13 = vpop.f32.mrb[0].mxu0 }
 0x1c7   : > { %v1563_v14 = vadd.f32 %v1559_v44, %v1554_v55  ;;  %v1552_v18 = vmul.f32 %v1550_v6, %v1043_v13  ;;  %v1045_v19 = vpop.f32.mrb[1].mxu0 }
 0x1c8   : > { %v1553_v20 = vmul.f32 %v1550_v6, %v1045_v19 }
 0x1c9   : > { %1567 = vst.msk [vmem:[%s270_s14 + $0x10] sm:$0xff] %vm1566_vm13, %v1563_v14  ;;  %v1561_v27 = vadd.f32 %v1559_v44, %v1552_v18 }
 0x1ca   : > { %v1562_v28 = vadd.f32 %v1559_v44, %v1553_v20 }
 0x1cb   : > { %1564 = vst [vmem:[%s270_s14] sm:$0xff] %v1561_v27 }
 0x1cc   : > { %1565 = vst [vmem:[%s270_s14 + $0x8] sm:$0xff] %v1562_v28 }
 0x1cd PF: > { %s14_s17 = sadd.s32 1, %s1995_s17   ;;  %s2360_s15 = smov %s1991_s16 }
 0x1ce   : > { %p11_p5 = scmp.ge.s32.totalorder %s14_s17, 4   ;;  %s2361_s16 = smov %s2363_s18 }
 0x1d0   :  { %13 = sbr.rel (!%p11_p5) target bundleno = 2 (0x2), region = 79 }

</bundles_post_ra>
